<compile_context>
chip_gen: v7x
topology: tpu7x:2x2x1
jax: 0.10.0
libtpu: 0.0.40
codegen_flags: <defaults>
</compile_context>

<pallas_src>
import math

import jax
import jax.numpy as jnp
from jax import lax
from jax.experimental import pallas as pl
from jax.experimental.pallas import tpu as pltpu


def _gelu_erf(x):
    # Exact (erf-based) GELU matching F.gelu(approximate='none').
    # erf via Abramowitz & Stegun 7.1.26 (|err| ~ 1e-7).  The rational factor
    # uses an exact divide (the review flagged the approximate EUP reciprocal
    # as too coarse inside the polynomial); the exp still lands on the EUP.
    # TODO(synk): a tanh-based GELU (== F.gelu(approximate='tanh'), <=~3e-4 abs
    # deviation) would move most of this off the binding VALU slot onto the EUP.
    a1, a2, a3, a4, a5 = 0.254829592, -0.284496736, 1.421413741, -1.453152027, 1.061405429
    p = 0.3275911
    z = jnp.abs(x) * 0.7071067811865476                 # |x| / sqrt(2)
    t = 1.0 / (1.0 + p * z)
    poly = ((((a5 * t + a4) * t + a3) * t + a2) * t + a1) * t
    erf_z = 1.0 - poly * jnp.exp(-z * z)                # exp -> EUP
    erf_x = jnp.where(x >= 0, erf_z, -erf_z)            # erf(x / sqrt(2))
    return 0.5 * x * (1.0 + erf_x)


def _pick_tile(n, cap):
    """Largest tile <= cap that divides n (prefers 128-multiples); else n."""
    if n <= cap:
        return n
    for t in (cap, cap // 2, cap // 4, 256, 128):
        if 0 < t <= n and n % t == 0:
            return t
    return n


def _pow2_floor(n):
    return 1 << (max(int(n), 1).bit_length() - 1)


# ----------------------------------------------------------------------------
# Wrapper
# ----------------------------------------------------------------------------
def atm_forward(query, key, value, params, num_head):
    """query/key/value: (B, in_planes, H, W) float32 (NCHW, like PyTorch)."""
    B, Cin, H, W = query.shape
    L = H * W
    num_dim = params["wq"].shape[0]
    head_dim = num_dim // num_head

    # Tiling.  Kernel-1 temporaries are bounded by (TK, TQ), independent of L.
    TP = _pick_tile(L, 1024)                     # projection spatial tile
    npp = L // TP
    TQ = _pick_tile(L, 1024)                     # query-axis tile of the score
    TK = _pick_tile(L, 512)                      # key-axis tile of the score
    nq, nk = L // TQ, L // TK
    tl_cap = min(8192, max(128, _pow2_floor((1 << 19) // max(Cin, num_head, 8))))
    TL = _pick_tile(L, tl_cap)                   # gate-kernel spatial tile
    nl = L // TL

    # ---- layout glue (no compute) ------------------------------------------
    qx_cf = query.reshape(B, Cin, L)                      # channels-first (native NCHW)
    kx_cl = key.reshape(B, Cin, L).transpose(0, 2, 1)     # channels-last (one XLA transpose)
    vflat = value.reshape(B, Cin, L)                      # channels-first

    wq = params["wq"]                                     # (num_dim, Cin)
    bq = params["bq"].reshape(num_dim, 1)
    wkT = params["wk"].T                                  # (Cin, num_dim)
    bk = params["bk"].reshape(1, num_dim)

    # ---- kernel 0: fused q/k 1x1 projections -> bf16 head-split operands ----
    def proj_kernel(qx_ref, kx_ref, wq_ref, bq_ref, wkT_ref, bk_ref,
                    qu_ref, ke_ref):
        # One GEMM per operand (full output width on the MXU; no per-head GEMMs).
        qu = jnp.dot(wq_ref[...], qx_ref[0],
                     preferred_element_type=jnp.float32) + bq_ref[...]     # (num_dim, TP)
        ke = jnp.dot(kx_ref[0], wkT_ref[...],
                     preferred_element_type=jnp.float32) + bk_ref[...]     # (TP, num_dim)
        for hh in range(num_head):                       # small static head split
            qu_ref[0, hh] = qu[hh * head_dim:(hh + 1) * head_dim, :].astype(jnp.bfloat16)
            ke_ref[0, hh] = ke[:, hh * head_dim:(hh + 1) * head_dim].astype(jnp.bfloat16)

    qu_cf, ke_cl = pl.pallas_call(
        proj_kernel,
        out_shape=(jax.ShapeDtypeStruct((B, num_head, head_dim, L), jnp.bfloat16),
                   jax.ShapeDtypeStruct((B, num_head, L, head_dim), jnp.bfloat16)),
        grid=(B, npp),
        in_specs=[
            pl.BlockSpec((1, Cin, TP), lambda b, p: (b, 0, p)),
            pl.BlockSpec((1, TP, Cin), lambda b, p: (b, p, 0)),
            pl.BlockSpec((num_dim, Cin), lambda b, p: (0, 0)),
            pl.BlockSpec((num_dim, 1), lambda b, p: (0, 0)),
            pl.BlockSpec((Cin, num_dim), lambda b, p: (0, 0)),
            pl.BlockSpec((1, num_dim), lambda b, p: (0, 0)),
        ],
        out_specs=(pl.BlockSpec((1, num_head, head_dim, TP), lambda b, p: (b, 0, 0, p)),
                   pl.BlockSpec((1, num_head, TP, head_dim), lambda b, p: (b, 0, p, 0))),
        compiler_params=pltpu.CompilerParams(
            dimension_semantics=("parallel", "parallel")),
    )(qx_cf, kx_cl, wq, bq, wkT, bk)

    # ---- kernel 1: score = sum_key gelu(qu @ ke), query+key tiled ------------
    def score_kernel(qu_ref, ke_ref, out_ref, acc_ref):
        kk = pl.program_id(3)

        @pl.when(kk == 0)
        def _init():
            acc_ref[...] = jnp.zeros_like(acc_ref)

        # S^T tile: (TK, hd) @ (hd, TQ) on the MXU (bf16 in, f32 accumulate).
        st = jnp.dot(ke_ref[0, 0], qu_ref[0, 0],
                     preferred_element_type=jnp.float32)                  # (TK, TQ)
        g = _gelu_erf(st)                                                 # f32
        # Key-axis partial sum on the XLU into a lane-dense (1, TQ) accumulator.
        acc_ref[...] += jnp.sum(g, axis=0, keepdims=True)

        @pl.when(kk == pl.num_programs(3) - 1)
        def _store():
            out_ref[...] = acc_ref[...].reshape(out_ref.shape)            # (1,1,1,TQ)

    score4 = pl.pallas_call(
        score_kernel,
        out_shape=jax.ShapeDtypeStruct((B, num_head, 1, L), jnp.float32),
        grid=(B, num_head, nq, nk),
        in_specs=[
            pl.BlockSpec((1, 1, head_dim, TQ), lambda b, h, q, k: (b, h, 0, q)),
            pl.BlockSpec((1, 1, TK, head_dim), lambda b, h, q, k: (b, h, k, 0)),
        ],
        out_specs=pl.BlockSpec((1, 1, 1, TQ), lambda b, h, q, k: (b, h, 0, q)),
        scratch_shapes=[pltpu.VMEM((1, TQ), jnp.float32)],
        compiler_params=pltpu.CompilerParams(
            dimension_semantics=("parallel", "parallel", "parallel", "arbitrary")),
    )(qu_cf, ke_cl)

    score = score4.reshape(B, num_head, L)

    # BatchNorm2d batch statistics (training mode, biased variance) — tiny
    # cross-batch reduction done in plain JAX glue.
    # TODO(synk): eval-mode BatchNorm (running-stats normalization) not implemented.
    mean = jnp.mean(score, axis=(0, 2))                                    # (num_head,)
    var = jnp.mean(jnp.square(score - mean[None, :, None]), axis=(0, 2))   # (num_head,)

    wv_h = params["wv"].T.reshape(num_head, Cin, 1)                        # (nh, Cin, 1)
    bv = params["bv"].reshape(Cin, 1)

    # ---- kernel 2: BN normalize + 1x1 v-conv + sigmoid gate + multiply -------
    # (When Cin/num_head < 8 the sublane dim of these blocks is padded to 8;
    #  acceptable for small-channel configs — the lane dim stays dense.)
    def gate_kernel(score_ref, mean_ref, var_ref, gamma_ref, beta_ref,
                    wv_ref, bv_ref, value_ref, out_ref):
        s = score_ref[0]                                                   # (nh, TL)
        scale = lax.rsqrt(var_ref[...] + 1e-5) * gamma_ref[...]            # (nh, 1)
        s_norm = (s - mean_ref[...]) * scale + beta_ref[...]               # (nh, TL)
        # 1x1 v-conv (K = num_head, too small for the MXU) as broadcast FMAs.
        logits = bv_ref[...] + wv_ref[0] * s_norm[0:1, :]                  # (Cin, TL)
        for hh in range(1, num_head):                                      # static unroll
            logits = logits + wv_ref[hh] * s_norm[hh:hh + 1, :]
        gate = jax.nn.sigmoid(logits)
        out_ref[...] = (value_ref[0] * gate).reshape(out_ref.shape)

    out = pl.pallas_call(
        gate_kernel,
        out_shape=jax.ShapeDtypeStruct((B, Cin, L), jnp.float32),
        grid=(B, nl),
        in_specs=[
            pl.BlockSpec((1, num_head, TL), lambda b, l: (b, 0, l)),
            pl.BlockSpec((num_head, 1), lambda b, l: (0, 0)),
            pl.BlockSpec((num_head, 1), lambda b, l: (0, 0)),
            pl.BlockSpec((num_head, 1), lambda b, l: (0, 0)),
            pl.BlockSpec((num_head, 1), lambda b, l: (0, 0)),
            pl.BlockSpec((num_head, Cin, 1), lambda b, l: (0, 0, 0)),
            pl.BlockSpec((Cin, 1), lambda b, l: (0, 0)),
            pl.BlockSpec((1, Cin, TL), lambda b, l: (b, 0, l)),
        ],
        out_specs=pl.BlockSpec((1, Cin, TL), lambda b, l: (b, 0, l)),
        compiler_params=pltpu.CompilerParams(
            dimension_semantics=("parallel", "parallel")),
    )(score, mean.reshape(num_head, 1), var.reshape(num_head, 1),
      params["bn_gamma"].reshape(num_head, 1), params["bn_beta"].reshape(num_head, 1),
      wv_h, bv, vflat)

    return out.reshape(B, Cin, H, W)


def init_params(rng, in_planes, num_dim, num_head):
    """Deterministic init matching weight_init: kaiming_normal(fan_in, relu),
    zero biases, BN gamma=1 / beta=0."""
    k1, k2, k3 = jax.random.split(rng, 3)
    std_qk = math.sqrt(2.0 / in_planes)        # Conv2d(in_planes -> num_dim, 1x1)
    std_v = math.sqrt(2.0 / num_head)          # Conv2d(num_head -> in_planes, 1x1)
    return {
        "wq": std_qk * jax.random.normal(k1, (num_dim, in_planes), jnp.float32),
        "bq": jnp.zeros((num_dim,), jnp.float32),
        "wk": std_qk * jax.random.normal(k2, (num_dim, in_planes), jnp.float32),
        "bk": jnp.zeros((num_dim,), jnp.float32),
        "wv": std_v * jax.random.normal(k3, (in_planes, num_head), jnp.float32),
        "bv": jnp.zeros((in_planes,), jnp.float32),
        "bn_gamma": jnp.ones((num_head,), jnp.float32),
        "bn_beta": jnp.zeros((num_head,), jnp.float32),
    }


if __name__ == "__main__":
    B, in_planes, H, W = 2, 4, 16, 16
    num_head, num_dim = 2, 32

    root = jax.random.PRNGKey(0)
    kq, kk, kv, kp = jax.random.split(root, 4)
    query = jax.random.normal(kq, (B, in_planes, H, W), jnp.float32)
    key = jax.random.normal(kk, (B, in_planes, H, W), jnp.float32)
    value = jax.random.normal(kv, (B, in_planes, H, W), jnp.float32)

    params = init_params(kp, in_planes, num_dim, num_head)

    out = atm_forward(query, key, value, params, num_head)
    out = jax.block_until_ready(out)
    assert out.shape == (B, in_planes, H, W)
    assert bool(jnp.all(jnp.isfinite(out)))
    print("KERNEL_OK")
</pallas_src>

<mosaic_0001>
module attributes {stable_mosaic.version = 11 : i64} {
  func.func @proj_kernel(%arg0: i32, %arg1: i32, %arg2: memref<1x4x256xf32, #tpu.memory_space<vmem>>, %arg3: memref<1x256x4xf32, #tpu.memory_space<vmem>>, %arg4: memref<32x4xf32, #tpu.memory_space<vmem>>, %arg5: memref<32x1xf32, #tpu.memory_space<vmem>>, %arg6: memref<4x32xf32, #tpu.memory_space<vmem>>, %arg7: memref<1x32xf32, #tpu.memory_space<vmem>>, %arg8: memref<1x2x16x256xbf16, #tpu.memory_space<vmem>>, %arg9: memref<1x2x256x16xbf16, #tpu.memory_space<vmem>>) attributes {dimension_semantics = [#tpu.dimension_semantics<parallel>, #tpu.dimension_semantics<parallel>], iteration_bounds = array<i64: 2, 1>, scalar_prefetch = 0 : i64, scratch_operands = 0 : i64, tpu.core_type = #tpu.core_type<tc>, window_params = [{transform_indices = @transform_0, window_bounds = array<i64: 1, 4, 256>}, {transform_indices = @transform_1, window_bounds = array<i64: 1, 256, 4>}, {pipeline_mode = #tpu.pipeline_mode<synchronous>, transform_indices = @transform_2, window_bounds = array<i64: 32, 4>}, {pipeline_mode = #tpu.pipeline_mode<synchronous>, transform_indices = @transform_3, window_bounds = array<i64: 32, 1>}, {pipeline_mode = #tpu.pipeline_mode<synchronous>, transform_indices = @transform_4, window_bounds = array<i64: 4, 32>}, {pipeline_mode = #tpu.pipeline_mode<synchronous>, transform_indices = @transform_5, window_bounds = array<i64: 1, 32>}, {transform_indices = @transform_6, window_bounds = array<i64: 1, 2, 16, 256>}, {transform_indices = @transform_7, window_bounds = array<i64: 1, 2, 256, 16>}]} {
    %c0 = arith.constant 0 : index
    %c0_0 = arith.constant 0 : index
    %0 = vector.load %arg4[%c0, %c0_0] : memref<32x4xf32, #tpu.memory_space<vmem>>, vector<32x4xf32>
    %c0_1 = arith.constant 0 : index
    %c0_2 = arith.constant 0 : index
    %c0_3 = arith.constant 0 : index
    %1 = vector.load %arg2[%c0_1, %c0_2, %c0_3] : memref<1x4x256xf32, #tpu.memory_space<vmem>>, vector<1x4x256xf32>
    %2 = vector.shape_cast %1 : vector<1x4x256xf32> to vector<4x256xf32>
    %cst = arith.constant dense<0.000000e+00> : vector<32x256xf32>
    %3 = tpu.matmul %0, %2, %cst {dimension_numbers = #tpu.dot_dimension_numbers<[1], [0], [0], [1], [0, 0, 1, 1], [], []>} : vector<32x4xf32>, vector<4x256xf32>, vector<32x256xf32> -> vector<32x256xf32>
    %c0_4 = arith.constant 0 : index
    %c0_5 = arith.constant 0 : index
    %4 = vector.load %arg5[%c0_4, %c0_5] : memref<32x1xf32, #tpu.memory_space<vmem>>, vector<32x1xf32>
    %5 = vector.broadcast %4 : vector<32x1xf32> to vector<32x256xf32>
    %6 = arith.addf %3, %5 : vector<32x256xf32>
    %c0_6 = arith.constant 0 : index
    %c0_7 = arith.constant 0 : index
    %c0_8 = arith.constant 0 : index
    %7 = vector.load %arg3[%c0_6, %c0_7, %c0_8] : memref<1x256x4xf32, #tpu.memory_space<vmem>>, vector<1x256x4xf32>
    %8 = vector.shape_cast %7 : vector<1x256x4xf32> to vector<256x4xf32>
    %c0_9 = arith.constant 0 : index
    %c0_10 = arith.constant 0 : index
    %9 = vector.load %arg6[%c0_9, %c0_10] : memref<4x32xf32, #tpu.memory_space<vmem>>, vector<4x32xf32>
    %cst_11 = arith.constant dense<0.000000e+00> : vector<256x32xf32>
    %10 = tpu.matmul %8, %9, %cst_11 {dimension_numbers = #tpu.dot_dimension_numbers<[1], [0], [0], [1], [0, 0, 1, 1], [], []>} : vector<256x4xf32>, vector<4x32xf32>, vector<256x32xf32> -> vector<256x32xf32>
    %c0_12 = arith.constant 0 : index
    %c0_13 = arith.constant 0 : index
    %11 = vector.load %arg7[%c0_12, %c0_13] : memref<1x32xf32, #tpu.memory_space<vmem>>, vector<1x32xf32>
    %12 = vector.broadcast %11 : vector<1x32xf32> to vector<256x32xf32>
    %13 = arith.addf %10, %12 : vector<256x32xf32>
    %14 = vector.extract_strided_slice %6 {offsets = [0, 0], sizes = [16, 256], strides = [1, 1]} : vector<32x256xf32> to vector<16x256xf32>
    %15 = arith.truncf %14 : vector<16x256xf32> to vector<16x256xbf16>
    %c0_14 = arith.constant 0 : index
    %c0_15 = arith.constant 0 : index
    %c0_16 = arith.constant 0 : index
    %c0_17 = arith.constant 0 : index
    %16 = vector.load %arg8[%c0_14, %c0_15, %c0_16, %c0_17] : memref<1x2x16x256xbf16, #tpu.memory_space<vmem>>, vector<1x1x16x256xbf16>
    %17 = vector.shape_cast %16 : vector<1x1x16x256xbf16> to vector<16x256xbf16>
    %18 = vector.shape_cast %15 : vector<16x256xbf16> to vector<1x1x16x256xbf16>
    tpu.vector_store %arg8[%c0_14, %c0_15, %c0_16, %c0_17], %18 {strides = array<i32>} : memref<1x2x16x256xbf16, #tpu.memory_space<vmem>>, vector<1x1x16x256xbf16>,
    %19 = vector.extract_strided_slice %13 {offsets = [0, 0], sizes = [256, 16], strides = [1, 1]} : vector<256x32xf32> to vector<256x16xf32>
    %20 = arith.truncf %19 : vector<256x16xf32> to vector<256x16xbf16>
    %c0_18 = arith.constant 0 : index
    %c0_19 = arith.constant 0 : index
    %c0_20 = arith.constant 0 : index
    %c0_21 = arith.constant 0 : index
    %21 = vector.load %arg9[%c0_18, %c0_19, %c0_20, %c0_21] : memref<1x2x256x16xbf16, #tpu.memory_space<vmem>>, vector<1x1x256x16xbf16>
    %22 = vector.shape_cast %21 : vector<1x1x256x16xbf16> to vector<256x16xbf16>
    %23 = vector.shape_cast %20 : vector<256x16xbf16> to vector<1x1x256x16xbf16>
    tpu.vector_store %arg9[%c0_18, %c0_19, %c0_20, %c0_21], %23 {strides = array<i32>} : memref<1x2x256x16xbf16, #tpu.memory_space<vmem>>, vector<1x1x256x16xbf16>,
    %24 = vector.extract_strided_slice %6 {offsets = [16, 0], sizes = [16, 256], strides = [1, 1]} : vector<32x256xf32> to vector<16x256xf32>
    %25 = arith.truncf %24 : vector<16x256xf32> to vector<16x256xbf16>
    %c0_22 = arith.constant 0 : index
    %c1 = arith.constant 1 : index
    %c0_23 = arith.constant 0 : index
    %c0_24 = arith.constant 0 : index
    %26 = vector.load %arg8[%c0_22, %c1, %c0_23, %c0_24] : memref<1x2x16x256xbf16, #tpu.memory_space<vmem>>, vector<1x1x16x256xbf16>
    %27 = vector.shape_cast %26 : vector<1x1x16x256xbf16> to vector<16x256xbf16>
    %28 = vector.shape_cast %25 : vector<16x256xbf16> to vector<1x1x16x256xbf16>
    tpu.vector_store %arg8[%c0_22, %c1, %c0_23, %c0_24], %28 {strides = array<i32>} : memref<1x2x16x256xbf16, #tpu.memory_space<vmem>>, vector<1x1x16x256xbf16>,
    %29 = vector.extract_strided_slice %13 {offsets = [0, 16], sizes = [256, 16], strides = [1, 1]} : vector<256x32xf32> to vector<256x16xf32>
    %30 = arith.truncf %29 : vector<256x16xf32> to vector<256x16xbf16>
    %c0_25 = arith.constant 0 : index
    %c1_26 = arith.constant 1 : index
    %c0_27 = arith.constant 0 : index
    %c0_28 = arith.constant 0 : index
    %31 = vector.load %arg9[%c0_25, %c1_26, %c0_27, %c0_28] : memref<1x2x256x16xbf16, #tpu.memory_space<vmem>>, vector<1x1x256x16xbf16>
    %32 = vector.shape_cast %31 : vector<1x1x256x16xbf16> to vector<256x16xbf16>
    %33 = vector.shape_cast %30 : vector<256x16xbf16> to vector<1x1x256x16xbf16>
    tpu.vector_store %arg9[%c0_25, %c1_26, %c0_27, %c0_28], %33 {strides = array<i32>} : memref<1x2x256x16xbf16, #tpu.memory_space<vmem>>, vector<1x1x256x16xbf16>,
    return
  }
  func.func @transform_0(%arg0: i32, %arg1: i32) -> (i32, i32, i32) {
    %c0_i32 = arith.constant 0 : i32
    %c0_i32_0 = arith.constant 0 : i32
    return %arg0, %c0_i32, %arg1 : i32, i32, i32
  }
  func.func @transform_1(%arg0: i32, %arg1: i32) -> (i32, i32, i32) {
    %c0_i32 = arith.constant 0 : i32
    %c0_i32_0 = arith.constant 0 : i32
    return %arg0, %arg1, %c0_i32 : i32, i32, i32
  }
  func.func @transform_2(%arg0: i32, %arg1: i32) -> (i32, i32) {
    %c0_i32 = arith.constant 0 : i32
    %c0_i32_0 = arith.constant 0 : i32
    %c0_i32_1 = arith.constant 0 : i32
    return %c0_i32, %c0_i32_0 : i32, i32
  }
  func.func @transform_3(%arg0: i32, %arg1: i32) -> (i32, i32) {
    %c0_i32 = arith.constant 0 : i32
    %c0_i32_0 = arith.constant 0 : i32
    %c0_i32_1 = arith.constant 0 : i32
    return %c0_i32, %c0_i32_0 : i32, i32
  }
  func.func @transform_4(%arg0: i32, %arg1: i32) -> (i32, i32) {
    %c0_i32 = arith.constant 0 : i32
    %c0_i32_0 = arith.constant 0 : i32
    %c0_i32_1 = arith.constant 0 : i32
    return %c0_i32, %c0_i32_0 : i32, i32
  }
  func.func @transform_5(%arg0: i32, %arg1: i32) -> (i32, i32) {
    %c0_i32 = arith.constant 0 : i32
    %c0_i32_0 = arith.constant 0 : i32
    %c0_i32_1 = arith.constant 0 : i32
    return %c0_i32, %c0_i32_0 : i32, i32
  }
  func.func @transform_6(%arg0: i32, %arg1: i32) -> (i32, i32, i32, i32) {
    %c0_i32 = arith.constant 0 : i32
    %c0_i32_0 = arith.constant 0 : i32
    %c0_i32_1 = arith.constant 0 : i32
    return %arg0, %c0_i32, %c0_i32_0, %arg1 : i32, i32, i32, i32
  }
  func.func @transform_7(%arg0: i32, %arg1: i32) -> (i32, i32, i32, i32) {
    %c0_i32 = arith.constant 0 : i32
    %c0_i32_0 = arith.constant 0 : i32
    %c0_i32_1 = arith.constant 0 : i32
    return %arg0, %c0_i32, %arg1, %c0_i32_0 : i32, i32, i32, i32
  }
}

</mosaic_0001>

<bundles_post_ra>
// kernel: tpu_custom_call.1
= control target key start
LH: loop header
LB: loop body
LE: loop exit
PB: predicated region body
PF: predicated region fallthrough
CT: control target
= control target key end

     0   :  { %13 = vsyncpa [#allocation3], 0  ;;  %s2235_s0 = inlined_call_operand.vmem [shape: f32[2,4,256], index: 0, kind: input, shape index: {}]   ;;  %s2236_s1 = inlined_call_operand.vmem [shape: f32[2,256,4], index: 1, kind: input, shape index: {}]   ;;  %s2237_s2 = inlined_call_operand.vmem [shape: f32[32,4], index: 2, kind: input, shape index: {}]   ;;  %s2238_s3 = inlined_call_operand.vmem [shape: f32[32,1], index: 3, kind: input, shape index: {}]   ;;  %s2239_s4 = inlined_call_operand.vmem [shape: f32[4,32], index: 4, kind: input, shape index: {}]   ;;  %s2240_s5 = inlined_call_operand.vmem [shape: f32[1,32], index: 5, kind: input, shape index: {}]   ;;  %s2241_s6 = inlined_call_operand.hbm [shape: bf16[2,2,16,256], index: 6, kind: output, shape index: {0}]   ;;  %s2242_s7 = inlined_call_operand.vmem [shape: bf16[2,2,256,16], index: 7, kind: output, shape index: {1}]  }
   0x1   :  { %15 = vsyncpa [#allocation3 + $0x1], 0  ;;  %s1793_s24 = smov 0   ;;  %s1795_s25 = smov 0  }
   0x2   :  { %s1797_s26 = smov 0   ;;  %s1799_s27 = smov 0  }
   0x3   :  { %s1801_s28 = smov 0   ;;  %s1803_s29 = smov 0  }
   0x4 LB: > { %s1352_s30 = sadd.s32 4294967295, %s1745_s29   ;;  %s1353_s8 = sadd.s32 4294967294, %s1745_s29   ;;  %s1745_s29 = sphi %s1803_s29, %s21_s29   ;;  %s1741_s28 = sphi %s1801_s28, %s2249_s28   ;;  %s1737_s27 = sphi %s1799_s27, %s2248_s27   ;;  %s1733_s26 = sphi %s1797_s26, %s2247_s26   ;;  %s1729_s25 = sphi %s1795_s25, %s2246_s25   ;;  %s1725_s24 = sphi %s1793_s24, %s2245_s24  }
   0x5   : > { %s33_s9 = sadd.s32 1, %s1741_s28  ;;  %s182_s10 = sadd.s32 1, %s1733_s26 }
   0x6   : > { %p35_p0 = scmp.ge.s32.totalorder %s33_s9, 2  ;;  %p192_p1 = scmp.ne.s32.totalorder %s1733_s26, %s1729_s25 }
   0x7   : > { %p193_p2 = scmp.eq.s32.totalorder %s1352_s30, 1  ;;  %p198_p3 = scmp.ne.s32.totalorder %s1729_s25, %s1725_s24 }
   0x8   : > { %s2251_s9 = smov (%p35_p0, %s33_s9), 0  ;;  %p199_p5 = scmp.eq.s32.totalorder %s1353_s8, 1 }
   0x9   : > { %p1833_p4 = por %p193_p2, %p192_p1  ;;  %s177_s12 = ssub.s32 %s1741_s28, %s2251_s9 }
   0xa   : > { %p1356_p6 = scmp.ge.s32.totalorder %s1745_s29, 1  ;;  %p180_p7 = scmp.eq.s32.totalorder %s177_s12, 0 }
   0xb   : > { %p1840_p8 = por %p199_p5, %p198_p3  ;;  %p283_p9 = scmp.lt.s32.totalorder %s1745_s29, 3 }
   0xc   : > { %s1846_s14 = scalar_select %p180_p7, %s1733_s26, %s182_s10  }
   0xd   : > { %p284_p10 = pnand %p1356_p6, %p283_p9 }
   0xe   : > { %vm412_vm0 = vcmask (!%p284_p10), 1043456   ;;  %v538_v0 = vld [vmem:[%s2239_s4] sm:$0xf] (!%p284_p10)  ;;  %p338_p11 = scmp.lt.s32.totalorder (!%p284_p10), %s1737_s27, 1  ;;  %v1747_v1 = vmov (!%p284_p10), 0.0   ;;  %v1748_v2 = vmov (!%p284_p10), 0  }
   0xf   : > { %287 = sbr.rel (%p284_p10) target bundleno = 431 (0x1af), region = 44  ;;  %1602 = vmatprep.subr.msk.mxu1 (!%p284_p10), %vm412_vm0, %v538_v0  ;;  %481 = vmatprep.mubr.f32.mxu0 (!%p284_p10), %v1747_v1  ;;  %v373_v3 = vld [vmem:[%s2238_s3] sm:$0xff] (!%p284_p10)  ;;  %v375_v4 = vld [vmem:[%s2238_s3 + $0x10] sm:$0xff] (!%p284_p10)  ;;  %vm399_vm1 = vcmask (!%p284_p10), 31744   ;;  %v374_v5 = vld [vmem:[%s2238_s3 + $0x8] sm:$0xff] (!%p284_p10)  ;;  %s323_s30 = sand.u32 (!%p284_p10), 1, %s1729_s25  }
  0x10   : > { %1603 = vmatpush3.msk.msra.mxu1 (!%p284_p10), %vm412_vm0, %v538_v0  ;;  %1664 = vset.pattern.permute.xlu0 (!%p284_p10), %v1748_v2  ;;  %v376_v6 = vld [vmem:[%s2238_s3 + $0x18] sm:$0xff] (!%p284_p10)  ;;  %v368_v12 = vld [vmem:[%s2237_s2] sm:$0xff] (!%p284_p10)  ;;  %v369_v15 = vld [vmem:[%s2237_s2 + $0x8] sm:$0xff] (!%p284_p10)  ;;  %vm1012_vm2 = vcmask (!%p284_p10), 125952   ;;  %s1357_s10 = sshll.u32 (!%p284_p10), %s323_s30, 5  ;;  %s1518_s16 = sshll.u32 (!%p284_p10), %s1737_s27, 9 }
  0x11   : > { %379 = vperm.xlu0 (!%p284_p10), %1664, %v373_v3   ;;  %1665 = vset.pattern.permute.xlu1 (!%p284_p10), %v1748_v2  ;;  %v370_v18 = vld [vmem:[%s2237_s2 + $0x10] sm:$0xff] (!%p284_p10)  ;;  %v371_v21 = vld [vmem:[%s2237_s2 + $0x18] sm:$0xff] (!%p284_p10)  ;;  %v1968_v45 = vld [vmem:[%s2240_s5] ss:$0 sm:$0xff] (!%p284_p10)  ;;  %s2113_s20 = scalar_lea.hbm (!%p284_p10), %s2241_s6, %s1518_s16 }
  0x12   : > { %389 = vperm.xlu1 (!%p284_p10), %1665, %v375_v4  }
  0x15   : > { %384 = vperm.xlu0 (!%p284_p10), %1664, %v374_v5  }
  0x16   : > { %s1855_s17 = scalar_select %p338_p11, %s1737_s27, 1  ;;  %394 = vperm.xlu1 %1665, %v376_v6  }
  0x18   : > { %s1480_s22 = sshll.u32 %s1855_s17, 8  ;;  %s1479_s23 = sshll.u32 %s1855_s17, 3 }
  0x19   : > { %s1873_s15 = scalar_lea.vmem %s2236_s1, %s1480_s22  ;;  %s345_s21 = scalar_lea.vmem %s2235_s0, %s1479_s23 }
  0x1a   : > { %v518_v7 = vld [vmem:[%s1873_s15 + $0x60] sm:$0xff]  ;;  %v519_v8 = vld [vmem:[%s1873_s15 + $0x68] sm:$0xff]  ;;  %v520_v9 = vld [vmem:[%s1873_s15 + $0x70] sm:$0xff]  ;;  %s1749_s17 = smov 112   ;;  %s1750_s23 = smov [#allocation2]  }
  0x1b   : > { %1572 = vmatprep.mubr.msk.f32.mxu1 %vm399_vm1, %v518_v7  ;;  %v372_v10 = vld [vmem:[%s345_s21] sm:$0xff]  ;;  %v521_v13 = vld [vmem:[%s1873_s15 + $0x78] sm:$0xff]  ;;  %v523_v16 = vld [vmem:[%s1873_s15 + $0x88] sm:$0xff]  ;;  %s2119_s21 = scalar_lea.sflag [#allocation3], %s323_s30 }
  0x1c   : > { %1573 = vmatmul.mubr.msk.f32.vlgmr.msra.gmra.mrb[0].mxu1 %vm399_vm1, %v519_v8  ;;  %v398_v11 = vcombine.high %v372_v10, %v372_v10  ;;  %v522_v14 = vld [vmem:[%s1873_s15 + $0x80] sm:$0xff]  ;;  %v524_v17 = vld [vmem:[%s1873_s15 + $0x90] sm:$0xff]  ;;  %v525_v19 = vld [vmem:[%s1873_s15 + $0x98] sm:$0xff] }
  0x1d   : > { %1575 = vmatprep.mubr.msk.f32.mxu1 %vm399_vm1, %v520_v9  ;;  %v526_v20 = vld [vmem:[%s1873_s15 + $0xa0] sm:$0xff]  ;;  %v527_v22 = vld [vmem:[%s1873_s15 + $0xa8] sm:$0xff]  ;;  %v528_v24 = vld [vmem:[%s1873_s15 + $0xb0] sm:$0xff] }
  0x1e   : > { %1364 = vmatprep.subr.msk.mxu0 %vm412_vm0, %v398_v11  ;;  %v506_v23 = vld [vmem:[%s1873_s15] sm:$0xff]  ;;  %v507_v25 = vld [vmem:[%s1873_s15 + $0x8] sm:$0xff]  ;;  %v529_v26 = vld [vmem:[%s1873_s15 + $0xb8] sm:$0xff] }
  0x1f   : > { %1365 = vmatpush1.msk.msra.mxu0 %vm412_vm0, %v372_v10  ;;  %v508_v27 = vld [vmem:[%s1873_s15 + $0x10] sm:$0xff]  ;;  %v530_v28 = vld [vmem:[%s1873_s15 + $0xc0] sm:$0xff]  ;;  %v509_v29 = vld [vmem:[%s1873_s15 + $0x18] sm:$0xff] }
  0x20   : > { %1366 = vmatmul.mubr.msk.f32.vlgmr.msra.gmra.mrb[0].mxu0 %vm399_vm1, %v368_v12  ;;  %1552 = vmatprep.subr.msk.mxu0 %vm412_vm0, %v538_v0  ;;  %v531_v30 = vld [vmem:[%s1873_s15 + $0xc8] sm:$0xff]  ;;  %v510_v31 = vld [vmem:[%s1873_s15 + $0x20] sm:$0xff]  ;;  %v532_v32 = vld [vmem:[%s1873_s15 + $0xd0] sm:$0xff] }
  0x21   : > { %1553 = vmatpush3.msk.msra.mxu0 %vm412_vm0, %v538_v0  ;;  %1576 = vmatmul.mubr.msk.f32.gmra.mrb[2].mxu1 %vm399_vm1, %v521_v13  ;;  %v511_v33 = vld [vmem:[%s1873_s15 + $0x28] sm:$0xff]  ;;  %v533_v34 = vld [vmem:[%s1873_s15 + $0xd8] sm:$0xff]  ;;  %v512_v35 = vld [vmem:[%s1873_s15 + $0x30] sm:$0xff] }
  0x22   : > { %487 = vmatprep.mubr.f32.mxu0 %v1747_v1  ;;  %1578 = vmatprep.mubr.msk.f32.mxu1 %vm399_vm1, %v522_v14  ;;  %v534_v36 = vld [vmem:[%s1873_s15 + $0xe0] sm:$0xff]  ;;  %v513_v37 = vld [vmem:[%s1873_s15 + $0x38] sm:$0xff]  ;;  %v535_v38 = vld [vmem:[%s1873_s15 + $0xe8] sm:$0xff] }
  0x23   : > { %v514_v39 = vld [vmem:[%s1873_s15 + $0x40] sm:$0xff]  ;;  %v536_v40 = vld [vmem:[%s1873_s15 + $0xf0] sm:$0xff]  ;;  %v515_v41 = vld [vmem:[%s1873_s15 + $0x48] sm:$0xff] }
  0x24   : > { %1367 = vmatmul.mubr.msk.f32.gmra.mrb[2].mxu0 %vm399_vm1, %v369_v15  ;;  %v516_v42 = vld [vmem:[%s1873_s15 + $0x50] sm:$0xff]  ;;  %v537_v43 = vld [vmem:[%s1873_s15 + $0xf8] sm:$0xff] }
  0x25   : > { %1579 = vmatmul.mubr.msk.f32.gmra.mrb[4].mxu1 %vm399_vm1, %v523_v16  ;;  %493 = vmatprep.mubr.f32.mxu0 %v1747_v1  ;;  %v517_v44 = vld [vmem:[%s1873_s15 + $0x58] sm:$0xff]  ;;  %s1977_s15 = scalar_lea.vmem %s2242_s7, %s1480_s22  ;;  %s1990_s22 = scalar_lea.vmem [#allocation2], %s1357_s10 }
  0x26   : > { %1581 = vmatprep.mubr.msk.f32.mxu1 %vm399_vm1, %v524_v17  ;;  %s1214_s12 = sshll.u32 %s1990_s22, 4  ;;  %s1671_s10 = sshll.u32 %s1750_s23, 4  ;;  %s2107_s12 = int_to_ptr.vmem [resolvable:$true] %s1214_s12  ;;  %s1672_s10 = int_to_ptr.vmem [resolvable:$false] %s1671_s10 }
  0x27   : > { %s1667_s8 = scalar_lea.vmem %s2107_s12, 512  ;;  %s1673_s27 = scalar_lea.vmem %s1672_s10, 1024 }
  0x28   : > { %1368 = vmatmul.mubr.msk.f32.gmra.mrb[4].mxu0 %vm399_vm1, %v370_v18  ;;  %p1668_p12 = scmp.ne.s32.totalorder %s2107_s12, %s1667_s8  ;;  %p1674_p1 = scmp.lt.s32.totalorder %s2107_s12, %s1672_s10 }
  0x29   : > { %1582 = vmatmul.mubr.msk.f32.gmra.mrb[6].mxu1 %vm399_vm1, %v525_v19  ;;  %499 = vmatprep.mubr.f32.mxu0 %v1747_v1  ;;  %p1675_p2 = scmp.lt.s32.totalorder %s1673_s27, %s1667_s8 }
  0x2a   : > { %1584 = vmatprep.mubr.msk.f32.mxu1 %vm399_vm1, %v526_v20  ;;  %p1669_p13 = pnand %p1668_p12, %p1833_p4 }
  0x2b   : > { %p1676_p3 = por %p1675_p2, %p1674_p1 }
  0x2c   : > { %1369 = vmatmul.mubr.msk.f32.gmra.mrb[6].mxu0 %vm399_vm1, %v371_v21  ;;  %p1670_p0 = pneg %p1669_p13 }
  0x2d   : > { %1585 = vmatmul.mubr.msk.f32.gmra.mrb[8].mxu1 %vm399_vm1, %v527_v22  ;;  %1554 = vmatprep.mubr.msk.f32.mxu0 %vm399_vm1, %v506_v23 }
  0x2e   : > { %1587 = vmatprep.mubr.msk.f32.mxu1 %vm399_vm1, %v528_v24  ;;  %p1677_p5 = pnand %p1676_p3, %p1670_p0 }
  0x30   : > { %1555 = vmatmul.mubr.msk.f32.vlgmr.msra.gmra.mrb[8].mxu0 %vm399_vm1, %v507_v25 }
  0x31   : > { %1588 = vmatmul.mubr.msk.f32.gmra.mrb[10].mxu1 %vm399_vm1, %v529_v26  ;;  %1557 = vmatprep.mubr.msk.f32.mxu0 %vm399_vm1, %v508_v27 }
  0x32   : > { %1590 = vmatprep.mubr.msk.f32.mxu1 %vm399_vm1, %v530_v28 }
  0x34   : > { %1558 = vmatmul.mubr.msk.f32.gmra.mrb[10].mxu0 %vm399_vm1, %v509_v29 }
  0x35   : > { %1591 = vmatmul.mubr.msk.f32.gmra.mrb[12].mxu1 %vm399_vm1, %v531_v30  ;;  %1560 = vmatprep.mubr.msk.f32.mxu0 %vm399_vm1, %v510_v31 }
  0x36   : > { %1593 = vmatprep.mubr.msk.f32.mxu1 %vm399_vm1, %v532_v32 }
  0x38   : > { %1561 = vmatmul.mubr.msk.f32.gmra.mrb[12].mxu0 %vm399_vm1, %v511_v33 }
  0x39   : > { %1594 = vmatmul.mubr.msk.f32.gmra.mrb[14].mxu1 %vm399_vm1, %v533_v34  ;;  %1563 = vmatprep.mubr.msk.f32.mxu0 %vm399_vm1, %v512_v35 }
  0x3a   : > { %1596 = vmatprep.mubr.msk.f32.mxu1 %vm399_vm1, %v534_v36 }
  0x3c   : > { %1564 = vmatmul.mubr.msk.f32.gmra.mrb[14].mxu0 %vm399_vm1, %v513_v37 }
  0x3d   : > { %1597 = vmatmul.mubr.msk.f32.gmra.mrb[16].mxu1 %vm399_vm1, %v535_v38  ;;  %1566 = vmatprep.mubr.msk.f32.mxu0 %vm399_vm1, %v514_v39 }
  0x3e   : > { %1599 = vmatprep.mubr.msk.f32.mxu1 %vm399_vm1, %v536_v40 }
  0x40   : > { %1567 = vmatmul.mubr.msk.f32.gmra.mrb[16].mxu0 %vm399_vm1, %v515_v41 }
  0x41   : > { %1569 = vmatprep.mubr.msk.f32.mxu0 %vm399_vm1, %v516_v42  ;;  %1600 = vmatmul.mubr.msk.f32.gmra.mrb[18].mxu1 %vm399_vm1, %v537_v43 }
  0x44   : > { %1570 = vmatmul.mubr.msk.f32.gmra.mrb[18].mxu0 %vm399_vm1, %v517_v44 }
  0x90   : > { %v380_v47 = vpop.permute.xlu0 %379 }
  0x91   : > { %v390_v1 = vpop.permute.xlu1 %389 }
  0x94   : > { %v385_v60 = vpop.permute.xlu0 %384 }
  0x95   : > { %v395_v20 = vpop.permute.xlu1 %394 }
  0xef   : > { %v1574_v46 = vpop.f32.mrb[0].mxu1 }
  0xf0   : > { %v777_v48 = vadd.f32 %v1574_v46, %v1968_v45  ;;  %v771_v49 = vpop.f32.mrb[1].mxu1 }
  0xf1   : > { %v772_v50 = vadd.f32 %v1968_v45, %v771_v49 }
  0xf2   : > { %v1497_v51 = vpack.c.bf16 %v777_v48, %v777_v48 }
  0xf3   : > { %v1496_v52 = vpack.c.bf16 %v772_v50, %v772_v50  ;;  %v483_v53 = vpop.f32.mrb[0].mxu0 }
  0xf4   : > { %1026 = vst.msk [vmem:[%s1977_s15 + $0x34] sm:$0xf] %vm1012_vm2, %v1497_v51  ;;  %v484_v54 = vadd.f32 %v483_v53, %v380_v47  ;;  %v485_v55 = vpop.f32.mrb[1].mxu0  ;;  %v1577_v56 = vpop.f32.mrb[2].mxu1  ;;  %1086 = vrot.lane.b32.xlu1 %v1497_v51, %s1749_s17 }
  0xf5   : > { %1025 = vst.msk [vmem:[%s1977_s15 + $0x30] sm:$0xf] %vm1012_vm2, %v1496_v52  ;;  %v486_v57 = vadd.f32 %v485_v55, %v380_v47  ;;  %v787_v58 = vadd.f32 %v1577_v56, %v1968_v45  ;;  %v781_v59 = vpop.f32.mrb[3].mxu1  ;;  %1084 = vrot.lane.b32.xlu0 %v1496_v52, %s1749_s17 }
  0xf6   : > { %v782_v61 = vadd.f32 %v1968_v45, %v781_v59 }
  0xf7   : > { %v1482_v62 = vpack.c.bf16 %v486_v57, %v484_v54  ;;  %v1499_v63 = vpack.c.bf16 %v787_v58, %v787_v58  ;;  %v489_v0 = vpop.f32.mrb[2].mxu0 }
  0xf8   : > { %v1498_v2 = vpack.c.bf16 %v782_v61, %v782_v61  ;;  %v490_v3 = vadd.f32 %v489_v0, %v385_v60  ;;  %v491_v4 = vpop.f32.mrb[3].mxu0  ;;  %v1580_v5 = vpop.f32.mrb[4].mxu1 }
  0xf9   : > { %882 = vst [vmem:[%s1990_s22] sm:$0xff] %v1482_v62  ;;  %1028 = vst.msk [vmem:[%s1977_s15 + $0x3c] sm:$0xf] %vm1012_vm2, %v1499_v63  ;;  %v492_v6 = vadd.f32 %v491_v4, %v385_v60  ;;  %v797_v7 = vadd.f32 %v1580_v5, %v1968_v45  ;;  %1090 = vrot.lane.b32.xlu1 %v1499_v63, %s1749_s17  ;;  %v791_v8 = vpop.f32.mrb[5].mxu1 }
  0xfa   : > { %1027 = vst.msk [vmem:[%s1977_s15 + $0x38] sm:$0xf] %vm1012_vm2, %v1498_v2  ;;  %v792_v9 = vadd.f32 %v1968_v45, %v791_v8  ;;  %1088 = vrot.lane.b32.xlu0 %v1498_v2, %s1749_s17 }
  0xfb   : > { %v1483_v10 = vpack.c.bf16 %v492_v6, %v490_v3  ;;  %v1501_v11 = vpack.c.bf16 %v797_v7, %v797_v7  ;;  %v495_v12 = vpop.f32.mrb[4].mxu0 }
  0xfc   : > { %v1500_v13 = vpack.c.bf16 %v792_v9, %v792_v9  ;;  %v496_v14 = vadd.f32 %v495_v12, %v390_v1  ;;  %v497_v15 = vpop.f32.mrb[5].mxu0  ;;  %v1583_v16 = vpop.f32.mrb[6].mxu1 }
  0xfd   : > { %883 = vst [vmem:[%s1990_s22 + $0x8] sm:$0xff] %v1483_v10  ;;  %1030 = vst.msk [vmem:[%s1977_s15 + $0x44] sm:$0xf] %vm1012_vm2, %v1501_v11  ;;  %v498_v17 = vadd.f32 %v497_v15, %v390_v1  ;;  %v807_v18 = vadd.f32 %v1583_v16, %v1968_v45  ;;  %1094 = vrot.lane.b32.xlu1 %v1501_v11, %s1749_s17  ;;  %v801_v19 = vpop.f32.mrb[7].mxu1 }
  0xfe   : > { %1029 = vst.msk [vmem:[%s1977_s15 + $0x40] sm:$0xf] %vm1012_vm2, %v1500_v13  ;;  %v802_v21 = vadd.f32 %v1968_v45, %v801_v19  ;;  %1092 = vrot.lane.b32.xlu0 %v1500_v13, %s1749_s17 }
  0xff   : > { %v1516_v22 = vpack.c.bf16 %v498_v17, %v496_v14  ;;  %v1503_v23 = vpack.c.bf16 %v807_v18, %v807_v18  ;;  %v501_v24 = vpop.f32.mrb[6].mxu0 }
 0x100   : > { %v1502_v25 = vpack.c.bf16 %v802_v21, %v802_v21  ;;  %v502_v26 = vadd.f32 %v501_v24, %v395_v20  ;;  %v503_v27 = vpop.f32.mrb[7].mxu0  ;;  %v1586_v28 = vpop.f32.mrb[8].mxu1 }
 0x101   : > { %1440 = vst [vmem:[%s1990_s22 + $0x10] sm:$0xff] %v1516_v22  ;;  %1032 = vst.msk [vmem:[%s1977_s15 + $0x4c] sm:$0xf] %vm1012_vm2, %v1503_v23  ;;  %v504_v29 = vadd.f32 %v503_v27, %v395_v20  ;;  %v817_v30 = vadd.f32 %v1586_v28, %v1968_v45  ;;  %1098 = vrot.lane.b32.xlu1 %v1503_v23, %s1749_s17  ;;  %v811_v31 = vpop.f32.mrb[9].mxu1 }
 0x102   : > { %1031 = vst.msk [vmem:[%s1977_s15 + $0x48] sm:$0xf] %vm1012_vm2, %v1502_v25  ;;  %v812_v32 = vadd.f32 %v1968_v45, %v811_v31  ;;  %1096 = vrot.lane.b32.xlu0 %v1502_v25, %s1749_s17 }
 0x103   : > { %v1517_v33 = vpack.c.bf16 %v504_v29, %v502_v26  ;;  %v1505_v34 = vpack.c.bf16 %v817_v30, %v817_v30  ;;  %v1556_v35 = vpop.f32.mrb[8].mxu0 }
 0x104   : > { %v1504_v36 = vpack.c.bf16 %v812_v32, %v812_v32  ;;  %v717_v37 = vadd.f32 %v1556_v35, %v1968_v45  ;;  %v711_v38 = vpop.f32.mrb[9].mxu0  ;;  %v1589_v39 = vpop.f32.mrb[10].mxu1 }
 0x105   : > { %1441 = vst [vmem:[%s1990_s22 + $0x18] sm:$0xff] %v1517_v33  ;;  %1034 = vst.msk [vmem:[%s1977_s15 + $0x54] sm:$0xf] %vm1012_vm2, %v1505_v34  ;;  %v712_v40 = vadd.f32 %v1968_v45, %v711_v38  ;;  %1102 = vrot.lane.b32.xlu1 %v1505_v34, %s1749_s17  ;;  %v827_v41 = vadd.f32 %v1589_v39, %v1968_v45  ;;  %v821_v42 = vpop.f32.mrb[11].mxu1 }
 0x106   : > { %1033 = vst.msk [vmem:[%s1977_s15 + $0x50] sm:$0xf] %vm1012_vm2, %v1504_v36  ;;  %v1485_v43 = vpack.c.bf16 %v717_v37, %v717_v37  ;;  %1100 = vrot.lane.b32.xlu0 %v1504_v36, %s1749_s17  ;;  %v822_v44 = vadd.f32 %v1968_v45, %v821_v42 }
 0x107   : > { %v1484_v46 = vpack.c.bf16 %v712_v40, %v712_v40  ;;  %v1507_v47 = vpack.c.bf16 %v827_v41, %v827_v41  ;;  %v1559_v48 = vpop.f32.mrb[10].mxu0 }
 0x108   : > { %1014 = vst.msk [vmem:[%s1977_s15 + $0x4] sm:$0xf] %vm1012_vm2, %v1485_v43  ;;  %v1506_v49 = vpack.c.bf16 %v822_v44, %v822_v44  ;;  %v727_v50 = vadd.f32 %v1559_v48, %v1968_v45  ;;  %v721_v51 = vpop.f32.mrb[11].mxu0  ;;  %v1592_v52 = vpop.f32.mrb[12].mxu1 }
 0x109   : > { %1013 = vst.msk [vmem:[%s1977_s15] sm:$0xf] %vm1012_vm2, %v1484_v46  ;;  %1036 = vst.msk [vmem:[%s1977_s15 + $0x5c] sm:$0xf] %vm1012_vm2, %v1507_v47  ;;  %1062 = vrot.lane.b32.xlu1 %v1485_v43, %s1749_s17  ;;  %v722_v53 = vadd.f32 %v1968_v45, %v721_v51  ;;  %v837_v54 = vadd.f32 %v1592_v52, %v1968_v45  ;;  %v831_v55 = vpop.f32.mrb[13].mxu1 }
 0x10a   : > { %1035 = vst.msk [vmem:[%s1977_s15 + $0x58] sm:$0xf] %vm1012_vm2, %v1506_v49  ;;  %1060 = vrot.lane.b32.xlu0 %v1484_v46, %s1749_s17  ;;  %v1487_v56 = vpack.c.bf16 %v727_v50, %v727_v50  ;;  %v832_v57 = vadd.f32 %v1968_v45, %v831_v55 }
 0x10b   : > { %v1486_v58 = vpack.c.bf16 %v722_v53, %v722_v53  ;;  %v1509_v59 = vpack.c.bf16 %v837_v54, %v837_v54  ;;  %v1562_v60 = vpop.f32.mrb[12].mxu0 }
 0x10c   : > { %1016 = vst.msk [vmem:[%s1977_s15 + $0xc] sm:$0xf] %vm1012_vm2, %v1487_v56  ;;  %v1508_v61 = vpack.c.bf16 %v832_v57, %v832_v57  ;;  %v737_v62 = vadd.f32 %v1562_v60, %v1968_v45  ;;  %v731_v63 = vpop.f32.mrb[13].mxu0  ;;  %v1595_v0 = vpop.f32.mrb[14].mxu1 }
 0x10d   : > { %1015 = vst.msk [vmem:[%s1977_s15 + $0x8] sm:$0xf] %vm1012_vm2, %v1486_v58  ;;  %1106 = vrot.lane.b32.xlu1 %v1507_v47, %s1749_s17  ;;  %1038 = vst.msk [vmem:[%s1977_s15 + $0x64] sm:$0xf] %vm1012_vm2, %v1509_v59  ;;  %v732_v1 = vadd.f32 %v1968_v45, %v731_v63  ;;  %v847_v2 = vadd.f32 %v1595_v0, %v1968_v45  ;;  %v841_v3 = vpop.f32.mrb[15].mxu1 }
 0x10e   : > { %1104 = vrot.lane.b32.xlu0 %v1506_v49, %s1749_s17  ;;  %1037 = vst.msk [vmem:[%s1977_s15 + $0x60] sm:$0xf] %vm1012_vm2, %v1508_v61  ;;  %v1489_v4 = vpack.c.bf16 %v737_v62, %v737_v62  ;;  %v842_v5 = vadd.f32 %v1968_v45, %v841_v3 }
 0x10f   : > { %v1488_v6 = vpack.c.bf16 %v732_v1, %v732_v1  ;;  %v1511_v7 = vpack.c.bf16 %v847_v2, %v847_v2  ;;  %v1565_v8 = vpop.f32.mrb[14].mxu0 }
 0x110   : > { %1018 = vst.msk [vmem:[%s1977_s15 + $0x14] sm:$0xf] %vm1012_vm2, %v1489_v4  ;;  %v1510_v9 = vpack.c.bf16 %v842_v5, %v842_v5  ;;  %v747_v10 = vadd.f32 %v1565_v8, %v1968_v45  ;;  %v741_v11 = vpop.f32.mrb[15].mxu0  ;;  %v1598_v12 = vpop.f32.mrb[16].mxu1 }
 0x111   : > { %1066 = vrot.lane.b32.xlu1 %v1487_v56, %s1749_s17  ;;  %1017 = vst.msk [vmem:[%s1977_s15 + $0x10] sm:$0xf] %vm1012_vm2, %v1488_v6  ;;  %1040 = vst.msk [vmem:[%s1977_s15 + $0x6c] sm:$0xf] %vm1012_vm2, %v1511_v7  ;;  %v742_v13 = vadd.f32 %v1968_v45, %v741_v11  ;;  %v857_v14 = vadd.f32 %v1598_v12, %v1968_v45  ;;  %v851_v15 = vpop.f32.mrb[17].mxu1 }
 0x112   : > { %1064 = vrot.lane.b32.xlu0 %v1486_v58, %s1749_s17  ;;  %1039 = vst.msk [vmem:[%s1977_s15 + $0x68] sm:$0xf] %vm1012_vm2, %v1510_v9  ;;  %v1491_v16 = vpack.c.bf16 %v747_v10, %v747_v10  ;;  %v852_v17 = vadd.f32 %v1968_v45, %v851_v15 }
 0x113   : > { %v1490_v18 = vpack.c.bf16 %v742_v13, %v742_v13  ;;  %v1513_v19 = vpack.c.bf16 %v857_v14, %v857_v14  ;;  %v1568_v20 = vpop.f32.mrb[16].mxu0 }
 0x114   : > { %1020 = vst.msk [vmem:[%s1977_s15 + $0x1c] sm:$0xf] %vm1012_vm2, %v1491_v16  ;;  %v1512_v21 = vpack.c.bf16 %v852_v17, %v852_v17  ;;  %v757_v22 = vadd.f32 %v1568_v20, %v1968_v45  ;;  %v751_v23 = vpop.f32.mrb[17].mxu0  ;;  %v1601_v24 = vpop.f32.mrb[18].mxu1 }
 0x115   : > { %1110 = vrot.lane.b32.xlu1 %v1509_v59, %s1749_s17  ;;  %1019 = vst.msk [vmem:[%s1977_s15 + $0x18] sm:$0xf] %vm1012_vm2, %v1490_v18  ;;  %1042 = vst.msk [vmem:[%s1977_s15 + $0x74] sm:$0xf] %vm1012_vm2, %v1513_v19  ;;  %v752_v25 = vadd.f32 %v1968_v45, %v751_v23  ;;  %v867_v26 = vadd.f32 %v1601_v24, %v1968_v45  ;;  %v861_v27 = vpop.f32.mrb[19].mxu1 }
 0x116   : > { %1108 = vrot.lane.b32.xlu0 %v1508_v61, %s1749_s17  ;;  %1041 = vst.msk [vmem:[%s1977_s15 + $0x70] sm:$0xf] %vm1012_vm2, %v1512_v21  ;;  %v1493_v28 = vpack.c.bf16 %v757_v22, %v757_v22  ;;  %v862_v29 = vadd.f32 %v1968_v45, %v861_v27 }
 0x117   : > { %v1492_v30 = vpack.c.bf16 %v752_v25, %v752_v25  ;;  %v1571_v31 = vpop.f32.mrb[18].mxu0  ;;  %v1515_v32 = vpack.c.bf16 %v867_v26, %v867_v26 }
 0x118   : > { %1022 = vst.msk [vmem:[%s1977_s15 + $0x24] sm:$0xf] %vm1012_vm2, %v1493_v28  ;;  %v767_v33 = vadd.f32 %v1571_v31, %v1968_v45  ;;  %v761_v34 = vpop.f32.mrb[19].mxu0  ;;  %v1514_v35 = vpack.c.bf16 %v862_v29, %v862_v29 }
 0x119   : > { %1070 = vrot.lane.b32.xlu1 %v1489_v4, %s1749_s17  ;;  %1021 = vst.msk [vmem:[%s1977_s15 + $0x20] sm:$0xf] %vm1012_vm2, %v1492_v30  ;;  %v762_v36 = vadd.f32 %v1968_v45, %v761_v34  ;;  %1044 = vst.msk [vmem:[%s1977_s15 + $0x7c] sm:$0xf] %vm1012_vm2, %v1515_v32 }
 0x11a   : > { %1068 = vrot.lane.b32.xlu0 %v1488_v6, %s1749_s17  ;;  %v1495_v37 = vpack.c.bf16 %v767_v33, %v767_v33  ;;  %1043 = vst.msk [vmem:[%s1977_s15 + $0x78] sm:$0xf] %vm1012_vm2, %v1514_v35 }
 0x11b   : > { %v1494_v38 = vpack.c.bf16 %v762_v36, %v762_v36 }
 0x11c   : > { %1024 = vst.msk [vmem:[%s1977_s15 + $0x2c] sm:$0xf] %vm1012_vm2, %v1495_v37 }
 0x11d   : > { %1114 = vrot.lane.b32.xlu1 %v1511_v7, %s1749_s17  ;;  %1023 = vst.msk [vmem:[%s1977_s15 + $0x28] sm:$0xf] %vm1012_vm2, %v1494_v38 }
 0x11e   : > { %1112 = vrot.lane.b32.xlu0 %v1510_v9, %s1749_s17 }
 0x121   : > { %1074 = vrot.lane.b32.xlu1 %v1491_v16, %s1749_s17 }
 0x122   : > { %1072 = vrot.lane.b32.xlu0 %v1490_v18, %s1749_s17 }
 0x125   : > { %1118 = vrot.lane.b32.xlu1 %v1513_v19, %s1749_s17 }
 0x126   : > { %1116 = vrot.lane.b32.xlu0 %v1512_v21, %s1749_s17 }
 0x127   : > { %1680 = shalt.err (!%p1677_p5)
}
 0x128   : > { %s1681_s30 = scalar_lea.hbm %s2113_s20, 512  ;;  %s1685_s18 = scalar_lea.hbm %s2241_s6, 1024 }
 0x129   : > { %p1682_p6 = scmp.ne.s32.totalorder %s2113_s20, %s1681_s30  ;;  %p1686_p10 = scmp.lt.u32.totalorder %s2113_s20, %s2241_s6 }
 0x12a   : > { %p1687_p11 = scmp.lt.u32.totalorder %s1685_s18, %s1681_s30  ;;  %p1689_p13 = scmp.lt.u32.totalorder %s1681_s30, %s2113_s20 }
 0x12b   : > { %p1683_p7 = pnand %p1682_p6, %p1833_p4 }
 0x12c   : > { %p1688_p12 = por %p1687_p11, %p1686_p10 }
 0x12d   : > { %p1684_p9 = pneg %p1683_p7 }
 0x12e   : > { %p1690_p0 = por %p1689_p13, %p1688_p12 }
 0x130   : > { %p1691_p1 = pnand %p1690_p0, %p1684_p9 }
 0x132   : > { %1694 = shalt.err (!%p1691_p1)
}
 0x133   : > { %s1751_s8 = smov 128   ;;  %s1752_s10 = smov 8   ;;  %1078 = vrot.lane.b32.xlu1 %v1493_v28, %s1749_s17  ;;  %1076 = vrot.lane.b32.xlu0 %v1492_v30, %s1749_s17 }
 0x134   : > { %1604 = dma.vmem_to_hbm [thread:$0]  (%p1833_p4), %s2107_s12, 512, %s2113_s20, %s2119_s21, %s1751_s8, %s1751_s8, %s1752_s10  }
 0x137   : > { %1082 = vrot.lane.b32.xlu1 %v1495_v37, %s1749_s17  ;;  %1080 = vrot.lane.b32.xlu0 %v1494_v38, %s1749_s17 }
 0x13b   : > { %1122 = vrot.lane.b32.xlu1 %v1515_v32, %s1749_s17  ;;  %1120 = vrot.lane.b32.xlu0 %v1514_v35, %s1749_s17 }
 0x166   : > { %v1087_v45 = vpop.permute.xlu1 %1086 }
 0x167   : > { %1455 = vst.msk [vmem:[%s1977_s15 + $0xb4] sm:$0xf] %vm1012_vm2, %v1087_v45  ;;  %v1085_v39 = vpop.permute.xlu0 %1084 }
 0x168   : > { %1454 = vst.msk [vmem:[%s1977_s15 + $0xb0] sm:$0xf] %vm1012_vm2, %v1085_v39 }
 0x16b   : > { %v1091_v40 = vpop.permute.xlu1 %1090 }
 0x16c   : > { %1457 = vst.msk [vmem:[%s1977_s15 + $0xbc] sm:$0xf] %vm1012_vm2, %v1091_v40  ;;  %v1089_v41 = vpop.permute.xlu0 %1088 }
 0x16d   : > { %1456 = vst.msk [vmem:[%s1977_s15 + $0xb8] sm:$0xf] %vm1012_vm2, %v1089_v41 }
 0x16f   : > { %v1095_v42 = vpop.permute.xlu1 %1094 }
 0x170   : > { %1459 = vst.msk [vmem:[%s1977_s15 + $0xc4] sm:$0xf] %vm1012_vm2, %v1095_v42  ;;  %v1093_v43 = vpop.permute.xlu0 %1092 }
 0x171   : > { %1458 = vst.msk [vmem:[%s1977_s15 + $0xc0] sm:$0xf] %vm1012_vm2, %v1093_v43 }
 0x173   : > { %v1099_v44 = vpop.permute.xlu1 %1098 }
 0x174   : > { %1461 = vst.msk [vmem:[%s1977_s15 + $0xcc] sm:$0xf] %vm1012_vm2, %v1099_v44  ;;  %v1097_v46 = vpop.permute.xlu0 %1096 }
 0x175   : > { %1460 = vst.msk [vmem:[%s1977_s15 + $0xc8] sm:$0xf] %vm1012_vm2, %v1097_v46 }
 0x177   : > { %v1103_v47 = vpop.permute.xlu1 %1102 }
 0x178   : > { %1463 = vst.msk [vmem:[%s1977_s15 + $0xd4] sm:$0xf] %vm1012_vm2, %v1103_v47  ;;  %v1101_v48 = vpop.permute.xlu0 %1100 }
 0x179   : > { %1462 = vst.msk [vmem:[%s1977_s15 + $0xd0] sm:$0xf] %vm1012_vm2, %v1101_v48 }
 0x17b   : > { %v1063_v49 = vpop.permute.xlu1 %1062 }
 0x17c   : > { %1443 = vst.msk [vmem:[%s1977_s15 + $0x84] sm:$0xf] %vm1012_vm2, %v1063_v49  ;;  %v1061_v50 = vpop.permute.xlu0 %1060 }
 0x17d   : > { %1442 = vst.msk [vmem:[%s1977_s15 + $0x80] sm:$0xf] %vm1012_vm2, %v1061_v50 }
 0x17f   : > { %v1107_v51 = vpop.permute.xlu1 %1106 }
 0x180   : > { %1465 = vst.msk [vmem:[%s1977_s15 + $0xdc] sm:$0xf] %vm1012_vm2, %v1107_v51  ;;  %v1105_v52 = vpop.permute.xlu0 %1104 }
 0x181   : > { %1464 = vst.msk [vmem:[%s1977_s15 + $0xd8] sm:$0xf] %vm1012_vm2, %v1105_v52 }
 0x183   : > { %v1067_v53 = vpop.permute.xlu1 %1066 }
 0x184   : > { %1445 = vst.msk [vmem:[%s1977_s15 + $0x8c] sm:$0xf] %vm1012_vm2, %v1067_v53  ;;  %v1065_v54 = vpop.permute.xlu0 %1064 }
 0x185   : > { %1444 = vst.msk [vmem:[%s1977_s15 + $0x88] sm:$0xf] %vm1012_vm2, %v1065_v54 }
 0x187   : > { %v1111_v55 = vpop.permute.xlu1 %1110 }
 0x188   : > { %1467 = vst.msk [vmem:[%s1977_s15 + $0xe4] sm:$0xf] %vm1012_vm2, %v1111_v55  ;;  %v1109_v56 = vpop.permute.xlu0 %1108 }
 0x189   : > { %1466 = vst.msk [vmem:[%s1977_s15 + $0xe0] sm:$0xf] %vm1012_vm2, %v1109_v56 }
 0x18b   : > { %v1071_v57 = vpop.permute.xlu1 %1070 }
 0x18c   : > { %1447 = vst.msk [vmem:[%s1977_s15 + $0x94] sm:$0xf] %vm1012_vm2, %v1071_v57  ;;  %v1069_v58 = vpop.permute.xlu0 %1068 }
 0x18d   : > { %1446 = vst.msk [vmem:[%s1977_s15 + $0x90] sm:$0xf] %vm1012_vm2, %v1069_v58 }
 0x18f   : > { %v1115_v59 = vpop.permute.xlu1 %1114 }
 0x190   : > { %1469 = vst.msk [vmem:[%s1977_s15 + $0xec] sm:$0xf] %vm1012_vm2, %v1115_v59  ;;  %v1113_v60 = vpop.permute.xlu0 %1112 }
 0x191   : > { %1468 = vst.msk [vmem:[%s1977_s15 + $0xe8] sm:$0xf] %vm1012_vm2, %v1113_v60 }
 0x193   : > { %v1075_v61 = vpop.permute.xlu1 %1074 }
 0x194   : > { %1449 = vst.msk [vmem:[%s1977_s15 + $0x9c] sm:$0xf] %vm1012_vm2, %v1075_v61  ;;  %v1073_v62 = vpop.permute.xlu0 %1072 }
 0x195   : > { %1448 = vst.msk [vmem:[%s1977_s15 + $0x98] sm:$0xf] %vm1012_vm2, %v1073_v62 }
 0x197   : > { %v1119_v63 = vpop.permute.xlu1 %1118 }
 0x198   : > { %1471 = vst.msk [vmem:[%s1977_s15 + $0xf4] sm:$0xf] %vm1012_vm2, %v1119_v63  ;;  %v1117_v0 = vpop.permute.xlu0 %1116 }
 0x199   : > { %1470 = vst.msk [vmem:[%s1977_s15 + $0xf0] sm:$0xf] %vm1012_vm2, %v1117_v0 }
 0x1a5   : > { %v1079_v1 = vpop.permute.xlu1 %1078  ;;  %v1077_v2 = vpop.permute.xlu0 %1076 }
 0x1a6   : > { %1451 = vst.msk [vmem:[%s1977_s15 + $0xa4] sm:$0xf] %vm1012_vm2, %v1079_v1  ;;  %1450 = vst.msk [vmem:[%s1977_s15 + $0xa0] sm:$0xf] %vm1012_vm2, %v1077_v2 }
 0x1a9   : > { %v1083_v3 = vpop.permute.xlu1 %1082  ;;  %v1081_v4 = vpop.permute.xlu0 %1080 }
 0x1aa   : > { %1453 = vst.msk [vmem:[%s1977_s15 + $0xac] sm:$0xf] %vm1012_vm2, %v1083_v3  ;;  %1452 = vst.msk [vmem:[%s1977_s15 + $0xa8] sm:$0xf] %vm1012_vm2, %v1081_v4 }
 0x1ad   : > { %v1123_v5 = vpop.permute.xlu1 %1122  ;;  %v1121_v6 = vpop.permute.xlu0 %1120 }
 0x1ae   : > { %1473 = vst.msk [vmem:[%s1977_s15 + $0xfc] sm:$0xf] %vm1012_vm2, %v1123_v5  ;;  %1472 = vst.msk [vmem:[%s1977_s15 + $0xf8] sm:$0xf] %vm1012_vm2, %v1121_v6 }
 0x1af PF: > { %p1610_p4 = scmp.ge.s32.totalorder %s1745_s29, 2  ;;  %s1233_s11 = sand.u32 1, %s1725_s24  }
 0x1b0   : > { %s1234_s17 = scalar_lea.sflag [#allocation3], %s1233_s11 }
 0x1b1   : > { %p1607_p2 = pnand %p1610_p4, %p1840_p8 }
 0x1b3   : > { %1720 = dma.done.wait (!%p1607_p2), %s1234_s17, 512  }
 0x1b4   : > { %1722 = vsyncadd (!%p1607_p2), %s1234_s17, 4294966784  ;;  %s21_s29 = sadd.s32 1, %s1745_s29   ;;  %s2245_s24 = smov %s1729_s25 }
 0x1b5   : > { %p18_p3 = scmp.ge.s32.totalorder %s21_s29, 4   ;;  %s2246_s25 = smov %s1733_s26 }
 0x1b6   : > { %s2247_s26 = smov %s1846_s14  ;;  %s2248_s27 = smov %s1741_s28 }
 0x1b7   : > { %s2249_s28 = smov %s2251_s9  ;;  %20 = sbr.rel (!%p18_p3) target bundleno = 4 (0x4), region = 96 }
 0x1be   :  { %1251 = vsyncpa [#allocation3], 1 }
 0x1bf   :  { %1253 = vsyncpa [#allocation3 + $0x1], 1 }

</bundles_post_ra>
